<compile_context>
chip_gen: v5e
topology: v5e:2x2
jax: 0.10.0
libtpu: 0.0.40
codegen_flags: <defaults>
</compile_context>

<pallas_src>
from functools import partial

import jax
import jax.numpy as jnp
from jax.experimental import pallas as pl
from jax.experimental.pallas import tpu as pltpu

HIDDEN_PAD = 128   # logical hidden = 64, zero-padded to a full lane width
HEAD_PAD = 128     # fused (A+1)-wide head, zero-padded to a full lane width
_SUBLANE = 8


def _round_up(x, m):
    return ((x + m - 1) // m) * m


def _cdiv(a, b):
    return -(-a // b)


def a2c_kernel(x_ref, w1_ref, b1_ref, w2_ref, b2_ref, wh_ref, bh_ref,
               out_ref, *, n_actions):
    x = x_ref[...]                                    # bf16 (TB, F)

    # fc_net: Linear -> ReLU -> Linear -> ReLU.
    # bf16 MXU operands, f32 accumulation; bias/ReLU in f32.
    h1 = jnp.dot(x, w1_ref[...], preferred_element_type=jnp.float32) + b1_ref[...]
    h1 = jnp.maximum(h1, 0.0)
    h2 = jnp.dot(h1.astype(jnp.bfloat16), w2_ref[...],
                 preferred_element_type=jnp.float32) + b2_ref[...]
    h2 = jnp.maximum(h2, 0.0)

    # Fused heads: one (H_pad, HEAD_PAD) matmul.
    #   columns [0, A)        -> action logits
    #   column  A             -> value
    #   columns (A, HEAD_PAD) -> zero padding (excluded from the softmax below)
    heads = jnp.dot(h2.astype(jnp.bfloat16), wh_ref[...],
                    preferred_element_type=jnp.float32) + bh_ref[...]

    col = jax.lax.broadcasted_iota(jnp.int32, heads.shape, 1)

    # Numerically-stable softmax over the real action columns only (f32).
    logits = jnp.where(col < n_actions, heads, -jnp.inf)
    m = jnp.max(logits, axis=-1, keepdims=True)
    e = jnp.exp(logits - m)                           # padded cols -> exp(-inf) = 0
    denom = jnp.sum(e, axis=-1, keepdims=True)
    # EXACT reciprocal (EUP): rows sum to 1 up to f32 rounding.
    probs = e * pl.reciprocal(denom, approx=False)

    # Single lane-dense store: probs in [0, A), value in col A, zeros after.
    out_ref[...] = jnp.where(col == n_actions, heads, probs).astype(out_ref.dtype)


def pack_params(params, n_actions):
    """Pad hidden to 128, fuse+pad the two heads, cast matmul weights to bf16."""
    w1, b1 = params["w1"], params["b1"]
    w2, b2 = params["w2"], params["b2"]
    wa, ba = params["wa"], params["ba"]
    wv, bv = params["wv"], params["bv"]
    F, H = w1.shape
    assert H <= HIDDEN_PAD and (n_actions + 1) <= HEAD_PAD

    def pad2(a, rows, cols):
        return jnp.pad(a, ((0, rows - a.shape[0]), (0, cols - a.shape[1])))

    wh = jnp.concatenate([wa, wv], axis=1)   # (H, A+1)
    bh = jnp.concatenate([ba, bv], axis=1)   # (1, A+1)

    return dict(
        w1=pad2(w1, F, HIDDEN_PAD).astype(jnp.bfloat16),
        b1=pad2(b1, 1, HIDDEN_PAD).astype(jnp.float32),
        w2=pad2(w2, HIDDEN_PAD, HIDDEN_PAD).astype(jnp.bfloat16),
        b2=pad2(b2, 1, HIDDEN_PAD).astype(jnp.float32),
        wh=pad2(wh, HIDDEN_PAD, HEAD_PAD).astype(jnp.bfloat16),
        bh=pad2(bh, 1, HEAD_PAD).astype(jnp.float32),
    )


def _choose_batch_tiling(B, tb_target):
    """Pick (TB, Bp, n_tiles): big tiles, tiny pad, >=2 steps for big batches."""
    n_tiles = max(1, _cdiv(B, tb_target))
    # v7x has 2 TensorCores; give the "parallel" axis >= 2 steps to shard when
    # the batch is large enough to be worth splitting.
    if n_tiles == 1 and B >= 256:
        n_tiles = 2
    TB = _round_up(_cdiv(B, n_tiles), _SUBLANE)   # Bp - B < 8 * n_tiles
    Bp = TB * n_tiles
    return TB, Bp, n_tiles


def a2c_forward(x, packed, n_actions, tb_target=1024):
    """x: (B, F) float32. packed: output of pack_params. Returns (probs, value)."""
    B, F = x.shape
    Hp = packed["w1"].shape[1]
    NP = packed["wh"].shape[1]

    TB, Bp, n_tiles = _choose_batch_tiling(B, tb_target)

    x = x.astype(jnp.bfloat16)                 # halves the streamed x bytes
    if Bp != B:
        x = jnp.pad(x, ((0, Bp - B), (0, 0)))  # < 8 rows of pad per tile

    def resident(shape):
        # Whole (small) weight/bias kept in VMEM across all grid steps.
        return pl.BlockSpec(shape, lambda i: tuple(0 for _ in shape))

    cost = pl.CostEstimate(
        flops=2 * Bp * (F * Hp + Hp * Hp + Hp * NP),
        transcendentals=Bp * (NP + 1),
        bytes_accessed=(2 * Bp * F                           # x tiles (bf16)
                        + 2 * (F * Hp + Hp * Hp + Hp * NP)   # weights (bf16)
                        + 4 * (Hp + Hp + NP)                 # biases (f32)
                        + 2 * Bp * NP),                      # out slab (bf16)
    )

    out = pl.pallas_call(
        partial(a2c_kernel, n_actions=n_actions),
        out_shape=jax.ShapeDtypeStruct((Bp, NP), jnp.bfloat16),
        grid_spec=pl.GridSpec(
            grid=(n_tiles,),
            in_specs=[
                pl.BlockSpec((TB, F), lambda i: (i, 0)),     # streamed batch tile
                resident((F, Hp)), resident((1, Hp)),
                resident((Hp, Hp)), resident((1, Hp)),
                resident((Hp, NP)), resident((1, NP)),
            ],
            out_specs=pl.BlockSpec((TB, NP), lambda i: (i, 0)),
        ),
        compiler_params=pltpu.CompilerParams(
            dimension_semantics=("parallel",)),
        cost_estimate=cost,
    )(x, packed["w1"], packed["b1"], packed["w2"], packed["b2"],
      packed["wh"], packed["bh"])

    probs = out[:B, :n_actions].astype(jnp.float32)
    value = out[:B, n_actions:n_actions + 1].astype(jnp.float32)
    return probs, value


def init_params(key, n_input_features, n_actions, n_hidden=64):
    """Deterministic init mimicking PyTorch Linear default (uniform +/- 1/sqrt(fan_in))."""
    ks = jax.random.split(key, 8)

    def lin(kw, kb, fan_in, fan_out):
        bound = 1.0 / jnp.sqrt(fan_in)
        w = jax.random.uniform(kw, (fan_in, fan_out), jnp.float32, -bound, bound)
        b = jax.random.uniform(kb, (1, fan_out), jnp.float32, -bound, bound)
        return w, b

    w1, b1 = lin(ks[0], ks[1], n_input_features, n_hidden)
    w2, b2 = lin(ks[2], ks[3], n_hidden, n_hidden)
    wa, ba = lin(ks[4], ks[5], n_hidden, n_actions)
    wv, bv = lin(ks[6], ks[7], n_hidden, 1)
    return dict(w1=w1, b1=b1, w2=w2, b2=b2, wa=wa, ba=ba, wv=wv, bv=bv)


if __name__ == "__main__":
    key = jax.random.PRNGKey(0)
    k_x, k_p = jax.random.split(key)

    B = 8                 # batch (x.view(B, -1) -> (B, n_input_features))
    n_input_features = 32
    n_actions = 8

    x = jax.random.normal(k_x, (B, n_input_features), jnp.float32)
    params = init_params(k_p, n_input_features, n_actions)
    packed = pack_params(params, n_actions)

    probs, value = a2c_forward(x, packed, n_actions)
    jax.block_until_ready((probs, value))

    # Pure-JAX f32 reference with the exact original A2CNet semantics.
    h = jnp.maximum(x @ params["w1"] + params["b1"], 0.0)
    h = jnp.maximum(h @ params["w2"] + params["b2"], 0.0)
    ref_probs = jax.nn.softmax(h @ params["wa"] + params["ba"], axis=-1)
    ref_value = h @ params["wv"] + params["bv"]

    assert probs.shape == (B, n_actions) and value.shape == (B, 1)
    # bf16 matmul operands + bf16 output slab -> compare against the f32
    # reference at bf16-level tolerances.
    assert jnp.allclose(probs, ref_probs, atol=5e-2, rtol=5e-2)
    assert jnp.allclose(value, ref_value, atol=5e-2, rtol=5e-2)
    # Exact reciprocal normalization: only the bf16 output cast perturbs the
    # row sums (< ~2e-3).
    assert jnp.allclose(jnp.sum(probs, axis=-1), 1.0, atol=1e-2)

    print("KERNEL_OK")
</pallas_src>

<mosaic_0001>
module attributes {stable_mosaic.version = 11 : i64} {
  func.func @a2c_kernel(%arg0: i32, %arg1: memref<8x32xbf16, #tpu.memory_space<vmem>>, %arg2: memref<32x128xbf16, #tpu.memory_space<vmem>>, %arg3: memref<1x128xf32, #tpu.memory_space<vmem>>, %arg4: memref<128x128xbf16, #tpu.memory_space<vmem>>, %arg5: memref<1x128xf32, #tpu.memory_space<vmem>>, %arg6: memref<128x128xbf16, #tpu.memory_space<vmem>>, %arg7: memref<1x128xf32, #tpu.memory_space<vmem>>, %arg8: memref<8x128xbf16, #tpu.memory_space<vmem>>) attributes {dimension_semantics = [#tpu.dimension_semantics<parallel>], iteration_bounds = array<i64: 1>, scalar_prefetch = 0 : i64, scratch_operands = 0 : i64, tpu.core_type = #tpu.core_type<tc>, window_params = [{transform_indices = @transform_0, window_bounds = array<i64: 8, 32>}, {pipeline_mode = #tpu.pipeline_mode<synchronous>, transform_indices = @transform_1, window_bounds = array<i64: 32, 128>}, {pipeline_mode = #tpu.pipeline_mode<synchronous>, transform_indices = @transform_2, window_bounds = array<i64: 1, 128>}, {pipeline_mode = #tpu.pipeline_mode<synchronous>, transform_indices = @transform_3, window_bounds = array<i64: 128, 128>}, {pipeline_mode = #tpu.pipeline_mode<synchronous>, transform_indices = @transform_4, window_bounds = array<i64: 1, 128>}, {pipeline_mode = #tpu.pipeline_mode<synchronous>, transform_indices = @transform_5, window_bounds = array<i64: 128, 128>}, {pipeline_mode = #tpu.pipeline_mode<synchronous>, transform_indices = @transform_6, window_bounds = array<i64: 1, 128>}, {transform_indices = @transform_7, window_bounds = array<i64: 8, 128>}]} {
    %c0 = arith.constant 0 : index
    %c0_0 = arith.constant 0 : index
    %0 = vector.load %arg1[%c0, %c0_0] : memref<8x32xbf16, #tpu.memory_space<vmem>>, vector<8x32xbf16>
    %c0_1 = arith.constant 0 : index
    %c0_2 = arith.constant 0 : index
    %1 = vector.load %arg2[%c0_1, %c0_2] : memref<32x128xbf16, #tpu.memory_space<vmem>>, vector<32x128xbf16>
    %cst = arith.constant dense<0.000000e+00> : vector<8x128xf32>
    %2 = tpu.matmul %0, %1, %cst {dimension_numbers = #tpu.dot_dimension_numbers<[1], [0], [0], [1], [0, 0, 1, 1], [], []>} : vector<8x32xbf16>, vector<32x128xbf16>, vector<8x128xf32> -> vector<8x128xf32>
    %c0_3 = arith.constant 0 : index
    %c0_4 = arith.constant 0 : index
    %3 = vector.load %arg3[%c0_3, %c0_4] : memref<1x128xf32, #tpu.memory_space<vmem>>, vector<1x128xf32>
    %4 = vector.broadcast %3 : vector<1x128xf32> to vector<8x128xf32>
    %5 = arith.addf %2, %4 : vector<8x128xf32>
    %cst_5 = arith.constant 0.000000e+00 : f32
    %6 = vector.broadcast %cst_5 : f32 to vector<8x128xf32>
    %7 = arith.maximumf %5, %6 : vector<8x128xf32>
    %8 = arith.truncf %7 : vector<8x128xf32> to vector<8x128xbf16>
    %c0_6 = arith.constant 0 : index
    %c0_7 = arith.constant 0 : index
    %9 = vector.load %arg4[%c0_6, %c0_7] : memref<128x128xbf16, #tpu.memory_space<vmem>>, vector<128x128xbf16>
    %cst_8 = arith.constant dense<0.000000e+00> : vector<8x128xf32>
    %10 = tpu.matmul %8, %9, %cst_8 {dimension_numbers = #tpu.dot_dimension_numbers<[1], [0], [0], [1], [0, 0, 1, 1], [], []>} : vector<8x128xbf16>, vector<128x128xbf16>, vector<8x128xf32> -> vector<8x128xf32>
    %c0_9 = arith.constant 0 : index
    %c0_10 = arith.constant 0 : index
    %11 = vector.load %arg5[%c0_9, %c0_10] : memref<1x128xf32, #tpu.memory_space<vmem>>, vector<1x128xf32>
    %12 = vector.broadcast %11 : vector<1x128xf32> to vector<8x128xf32>
    %13 = arith.addf %10, %12 : vector<8x128xf32>
    %cst_11 = arith.constant 0.000000e+00 : f32
    %14 = vector.broadcast %cst_11 : f32 to vector<8x128xf32>
    %15 = arith.maximumf %13, %14 : vector<8x128xf32>
    %16 = arith.truncf %15 : vector<8x128xf32> to vector<8x128xbf16>
    %c0_12 = arith.constant 0 : index
    %c0_13 = arith.constant 0 : index
    %17 = vector.load %arg6[%c0_12, %c0_13] : memref<128x128xbf16, #tpu.memory_space<vmem>>, vector<128x128xbf16>
    %cst_14 = arith.constant dense<0.000000e+00> : vector<8x128xf32>
    %18 = tpu.matmul %16, %17, %cst_14 {dimension_numbers = #tpu.dot_dimension_numbers<[1], [0], [0], [1], [0, 0, 1, 1], [], []>} : vector<8x128xbf16>, vector<128x128xbf16>, vector<8x128xf32> -> vector<8x128xf32>
    %c0_15 = arith.constant 0 : index
    %c0_16 = arith.constant 0 : index
    %19 = vector.load %arg7[%c0_15, %c0_16] : memref<1x128xf32, #tpu.memory_space<vmem>>, vector<1x128xf32>
    %20 = vector.broadcast %19 : vector<1x128xf32> to vector<8x128xf32>
    %21 = arith.addf %18, %20 : vector<8x128xf32>
    %22 = tpu.iota {dimensions = array<i32: 1>} : vector<8x128xi32>
    %c8_i32 = arith.constant 8 : i32
    %23 = vector.broadcast %c8_i32 : i32 to vector<8x128xi32>
    %24 = arith.cmpi slt, %22, %23 : vector<8x128xi32>
    %cst_17 = arith.constant 0xFF800000 : f32
    %25 = vector.broadcast %cst_17 : f32 to vector<8x128xf32>
    %26 = arith.select %24, %21, %25 : vector<8x128xi1>, vector<8x128xf32>
    %cst_18 = arith.constant dense<0xFF800000> : vector<8xf32>
    %27 = vector.multi_reduction <maximumf>, %26, %cst_18 [1] : vector<8x128xf32> to vector<8xf32>
    %28 = vector.shape_cast %27 : vector<8xf32> to vector<8x1xf32>
    %29 = vector.broadcast %28 : vector<8x1xf32> to vector<8x128xf32>
    %30 = arith.subf %26, %29 : vector<8x128xf32>
    %31 = math.exp %30 : vector<8x128xf32>
    %cst_19 = arith.constant dense<0.000000e+00> : vector<8xf32>
    %32 = vector.multi_reduction <add>, %31, %cst_19 [1] : vector<8x128xf32> to vector<8xf32>
    %33 = vector.shape_cast %32 : vector<8xf32> to vector<8x1xf32>
    %34 = tpu.reciprocal %33 : vector<8x1xf32> -> vector<8x1xf32>
    %35 = vector.broadcast %34 : vector<8x1xf32> to vector<8x128xf32>
    %36 = arith.mulf %31, %35 : vector<8x128xf32>
    %c8_i32_20 = arith.constant 8 : i32
    %37 = vector.broadcast %c8_i32_20 : i32 to vector<8x128xi32>
    %38 = arith.cmpi eq, %22, %37 : vector<8x128xi32>
    %39 = arith.select %38, %21, %36 : vector<8x128xi1>, vector<8x128xf32>
    %40 = arith.truncf %39 : vector<8x128xf32> to vector<8x128xbf16>
    %c0_21 = arith.constant 0 : index
    %c0_22 = arith.constant 0 : index
    %41 = vector.load %arg8[%c0_21, %c0_22] : memref<8x128xbf16, #tpu.memory_space<vmem>>, vector<8x128xbf16>
    tpu.vector_store %arg8[%c0_21, %c0_22], %40 {strides = array<i32>} : memref<8x128xbf16, #tpu.memory_space<vmem>>, vector<8x128xbf16>,
    return
  }
  func.func @transform_0(%arg0: i32) -> (i32, i32) {
    %c0_i32 = arith.constant 0 : i32
    %c0_i32_0 = arith.constant 0 : i32
    return %arg0, %c0_i32 : i32, i32
  }
  func.func @transform_1(%arg0: i32) -> (i32, i32) {
    %c0_i32 = arith.constant 0 : i32
    %c0_i32_0 = arith.constant 0 : i32
    %c0_i32_1 = arith.constant 0 : i32
    return %c0_i32, %c0_i32_0 : i32, i32
  }
  func.func @transform_2(%arg0: i32) -> (i32, i32) {
    %c0_i32 = arith.constant 0 : i32
    %c0_i32_0 = arith.constant 0 : i32
    %c0_i32_1 = arith.constant 0 : i32
    return %c0_i32, %c0_i32_0 : i32, i32
  }
  func.func @transform_3(%arg0: i32) -> (i32, i32) {
    %c0_i32 = arith.constant 0 : i32
    %c0_i32_0 = arith.constant 0 : i32
    %c0_i32_1 = arith.constant 0 : i32
    return %c0_i32, %c0_i32_0 : i32, i32
  }
  func.func @transform_4(%arg0: i32) -> (i32, i32) {
    %c0_i32 = arith.constant 0 : i32
    %c0_i32_0 = arith.constant 0 : i32
    %c0_i32_1 = arith.constant 0 : i32
    return %c0_i32, %c0_i32_0 : i32, i32
  }
  func.func @transform_5(%arg0: i32) -> (i32, i32) {
    %c0_i32 = arith.constant 0 : i32
    %c0_i32_0 = arith.constant 0 : i32
    %c0_i32_1 = arith.constant 0 : i32
    return %c0_i32, %c0_i32_0 : i32, i32
  }
  func.func @transform_6(%arg0: i32) -> (i32, i32) {
    %c0_i32 = arith.constant 0 : i32
    %c0_i32_0 = arith.constant 0 : i32
    %c0_i32_1 = arith.constant 0 : i32
    return %c0_i32, %c0_i32_0 : i32, i32
  }
  func.func @transform_7(%arg0: i32) -> (i32, i32) {
    %c0_i32 = arith.constant 0 : i32
    %c0_i32_0 = arith.constant 0 : i32
    return %arg0, %c0_i32 : i32, i32
  }
}

</mosaic_0001>

<bundles_post_ra>
// kernel: tpu_custom_call.1
= control target key start
LH: loop header
LB: loop body
LE: loop exit
PB: predicated region body
PF: predicated region fallthrough
CT: control target
= control target key end

     0   :  { %12 = vsyncpa [#allocation3], 0  ;;  %s646_s0 = inlined_call_operand.hbm [shape: bf16[8,32], index: 0, kind: input, shape index: {}]   ;;  %s647_s1 = inlined_call_operand.hbm [shape: bf16[32,128], index: 1, kind: input, shape index: {}]   ;;  %s648_s2 = inlined_call_operand.vmem [shape: f32[1,128], index: 2, kind: input, shape index: {}]   ;;  %s649_s3 = inlined_call_operand.hbm [shape: bf16[128,128], index: 3, kind: input, shape index: {}]   ;;  %s650_s4 = inlined_call_operand.vmem [shape: f32[1,128], index: 4, kind: input, shape index: {}]   ;;  %s651_s5 = inlined_call_operand.hbm [shape: bf16[128,128], index: 5, kind: input, shape index: {}]   ;;  %s652_s6 = inlined_call_operand.vmem [shape: f32[1,128], index: 6, kind: input, shape index: {}]   ;;  %s653_s7 = inlined_call_operand.hbm [shape: bf16[8,128], index: 7, kind: output, shape index: {}]  }
   0x1   :  { %13 = vsyncpa [#allocation6], 0 }
   0x2   :  { %14 = vsyncpa [#allocation9], 0  ;;  %s31_s26 = sshll.u32 %s647_s1, 4  ;;  %s32_s26 = int_to_ptr.hbm [resolvable:$true] %s31_s26 }
   0x3   :  { %15 = vsyncpa [#allocation4], 0  ;;  %s575_s27 = smov [#allocation5]   ;;  %s21_s8 = sshll.u32 %s646_s0, 4  ;;  %s22_s8 = int_to_ptr.hbm [resolvable:$true] %s21_s8 }
   0x4   :  { %s33_s28 = sshll.u32 %s575_s27, 4  ;;  %s576_s9 = smov 64   ;;  %s34_s28 = int_to_ptr.vmem [resolvable:$true] %s33_s28 }
   0x5   :  { %s577_s10 = smov 4   ;;  %s578_s11 = smov [#allocation2]  }
   0x6   :  { %39 = dma.hbm_to_vmem [thread:$0]  %s32_s26, 256, %s34_s28, [#allocation6], %s576_s9, %s576_s9, %s577_s10  }
   0x7   :  { %s23_s12 = sshll.u32 %s578_s11, 4  ;;  %s46_s15 = sshll.u32 %s649_s3, 4  ;;  %s24_s12 = int_to_ptr.vmem [resolvable:$true] %s23_s12  ;;  %s47_s15 = int_to_ptr.hbm [resolvable:$true] %s46_s15 }
   0x8   :  { %26 = dma.hbm_to_vmem [thread:$0]  %s22_s8, 64, %s24_s12, [#allocation3]  }
   0x9   :  { %s61_s17 = sshll.u32 %s651_s5, 4  ;;  %s579_s18 = smov [#allocation7]   ;;  %s62_s17 = int_to_ptr.hbm [resolvable:$true] %s61_s17 }
   0xa   :  { %s48_s19 = sshll.u32 %s579_s18, 4  ;;  %s580_s0 = smov [#allocation8]   ;;  %s49_s19 = int_to_ptr.vmem [resolvable:$true] %s48_s19 }
   0xb   :  { %54 = dma.hbm_to_vmem [thread:$0]  %s47_s15, 1024, %s49_s19, [#allocation6], %s576_s9, %s576_s9, %s577_s10  }
   0xc   :  { %s63_s20 = sshll.u32 %s580_s0, 4  ;;  %s64_s20 = int_to_ptr.vmem [resolvable:$true] %s63_s20 }
   0xd   :  { %69 = dma.hbm_to_vmem [thread:$0]  %s62_s17, 1024, %s64_s20, [#allocation9], %s576_s9, %s576_s9, %s577_s10  }
   0xe   :  { %567 = dma.done.wait [#allocation3], 64  }
   0xf   :  { %568 = vsyncadd [#allocation3], 4294967232 }
  0x10   :  { %569 = dma.done.wait [#allocation6], 1280  }
  0x11   :  { %570 = vsyncadd [#allocation6], 4294966016 }
  0x12   :  { %571 = dma.done.wait [#allocation9], 1024  }
  0x13   :  { %572 = vsyncadd [#allocation9], 4294966272  ;;  %v416_v0 = vld [vmem:[#allocation5 + $0x8] sm:$0xff]  ;;  %v415_v2 = vld [vmem:[#allocation5] sm:$0xff]  ;;  %vm110_vm0 = vcmask 261120   ;;  %v293_v31 = vlaneseq  ;;  %s330_s26 = sshll.u32 %s653_s7, 4  ;;  %s331_s26 = int_to_ptr.hbm [resolvable:$true] %s330_s26 }
  0x14   :  { %v424_v1 = vld [vmem:[#allocation7 + $0x38] sm:$0xff]  ;;  %120 = vmatpush.bf16.msra.mxu0 %v416_v0  ;;  %v423_v3 = vld [vmem:[#allocation7 + $0x30] sm:$0xff]  ;;  %v89_v4 = vld [vmem:[#allocation2] sm:$0xf] }
  0x15   :  { %197 = vmatpush.bf16.msra.mxu1 %v424_v1  ;;  %v422_v5 = vld [vmem:[#allocation7 + $0x28] sm:$0xff]  ;;  %v421_v6 = vld [vmem:[#allocation7 + $0x20] sm:$0xff]  ;;  %v420_v7 = vld [vmem:[#allocation7 + $0x18] sm:$0xff]  ;;  %v294_v32 = vand.u32 127, %v293_v31 }
  0x16   :  { %v419_v8 = vld [vmem:[#allocation7 + $0x10] sm:$0xff]  ;;  %v418_v9 = vld [vmem:[#allocation7 + $0x8] sm:$0xff]  ;;  %v417_v10 = vld [vmem:[#allocation7] sm:$0xff] }
  0x17   :  { %v432_v11 = vld [vmem:[#allocation8 + $0x38] sm:$0xff]  ;;  %v431_v12 = vld [vmem:[#allocation8 + $0x30] sm:$0xff]  ;;  %v430_v13 = vld [vmem:[#allocation8 + $0x28] sm:$0xff]  ;;  %vm295_vm1 = vcmp.lt.s32.totalorder %v294_v32, 8  ;;  %vm319_vm6 = vcmp.eq.s32.totalorder %v294_v32, 8 }
  0x18   :  { %121 = vmatpush.bf16.msra.mxu0 %v415_v2  ;;  %280 = vmatpush.bf16.msra.mxu2 %v432_v11  ;;  %v429_v14 = vld [vmem:[#allocation8 + $0x20] sm:$0xff]  ;;  %v428_v15 = vld [vmem:[#allocation8 + $0x18] sm:$0xff]  ;;  %v427_v16 = vld [vmem:[#allocation8 + $0x10] sm:$0xff] }
  0x19   :  { %198 = vmatpush.bf16.msra.mxu1 %v423_v3  ;;  %v440_v17 = vld [vmem:[%s648_s2] ss:$0 sm:$0xff]  ;;  %v425_v24 = vld [vmem:[#allocation8] sm:$0xff] }
  0x1a   :  { %v426_v23 = vld [vmem:[#allocation8 + $0x8] sm:$0xff] }
  0x1b   :  { %350 = vmatmul.msk.bf16.vlgmr.msra.gmra.mxu0 %vm110_vm0, %v89_v4  ;;  %v441_v25 = vld [vmem:[%s650_s4] ss:$0 sm:$0xff]  ;;  %s581_s4 = smov [#allocation10]  }
  0x1c   :  { %281 = vmatpush.bf16.msra.mxu2 %v431_v12  ;;  %v442_v33 = vld [vmem:[%s652_s6] ss:$0 sm:$0xff]  ;;  %s328_s6 = sshll.u32 %s581_s4, 4  ;;  %s329_s6 = int_to_ptr.vmem [resolvable:$true] %s328_s6 }
  0x1d   :  { %199 = vmatpush.bf16.msra.mxu1 %v422_v5 }
  0x20   :  { %282 = vmatpush.bf16.msra.mxu2 %v430_v13 }
  0x21   :  { %200 = vmatpush.bf16.msra.mxu1 %v421_v6 }
  0x24   :  { %283 = vmatpush.bf16.msra.mxu2 %v429_v14 }
  0x25   :  { %201 = vmatpush.bf16.msra.mxu1 %v420_v7 }
  0x28   :  { %284 = vmatpush.bf16.msra.mxu2 %v428_v15 }
  0x29   :  { %202 = vmatpush.bf16.msra.mxu1 %v419_v8 }
  0x2c   :  { %285 = vmatpush.bf16.msra.mxu2 %v427_v16 }
  0x2d   :  { %203 = vmatpush.bf16.msra.mxu1 %v418_v9 }
  0x30   :  { %286 = vmatpush.bf16.msra.mxu2 %v426_v23 }
  0x31   :  { %204 = vmatpush.bf16.msra.mxu1 %v417_v10 }
  0x34   :  { %287 = vmatpush.bf16.msra.mxu2 %v425_v24 }
  0x98   :  { %v123_v18 = vpop.f32.mrf.mxu0 }
  0x99   :  { %v124_v19 = vadd.f32 %v440_v17, %v123_v18 }
  0x9b   :  { %v127_v20 = vmax.f32 %v124_v19, 0.0 }
  0x9d   :  { %v128_v21 = vpack.c.bf16 %v127_v20, %v127_v20 }
  0x9f   :  { %205 = vmatmul.bf16.vlgmr.msra.gmra.mxu1 %v128_v21 }
  0xa0   :  { %v125_v22 = vpop.f32.mrf.mxu0 }
 0x11c   :  { %v206_v26 = vpop.f32.mrf.mxu1 }
 0x11d   :  { %v207_v27 = vadd.f32 %v441_v25, %v206_v26 }
 0x11f   :  { %v210_v28 = vmax.f32 %v207_v27, 0.0 }
 0x121   :  { %v211_v29 = vpack.c.bf16 %v210_v28, %v210_v28 }
 0x123   :  { %288 = vmatmul.bf16.vlgmr.msra.gmra.mxu2 %v211_v29 }
 0x124   :  { %v208_v30 = vpop.f32.mrf.mxu1 }
 0x1a6   :  { %v289_v34 = vpop.f32.mrf.mxu2 }
 0x1a7   :  { %v290_v35 = vadd.f32 %v442_v33, %v289_v34 }
 0x1a9   :  { %v296_v36 = vsel %vm295_vm1, %v290_v35, -inf }
 0x1aa   :  { %297 = vmax.xlane.f32.xlu0 %v296_v36 }
 0x1ae   :  { %v291_v37 = vpop.f32.mrf.mxu2 }
 0x21d   :  { %v298_v38 = vpop.xlane.xlu0 %297 }
 0x21e   :  { %v299_v39 = vsub.f32 %v296_v36, %v298_v38 }
 0x220   :  { %v300_v40 = vmul.f32 1.442695, %v299_v39 }
 0x222   :  { %443 = vpow2.f32 %v300_v40 }
 0x228   :  { %v444_v41 = vpop.eup %443 }
 0x229   :  { %302 = vadd.xlane.f32.xlu0 %v444_v41 }
 0x29c   :  { %v303_v42 = vpop.xlane.xlu0 %302 }
 0x29d   :  { %445 = vrcp.f32 %v303_v42  ;;  %v315_v46 = vand.u32 2147483648, %v303_v42  ;;  %v313_v48 = vand.u32 2147483647, %v303_v42  ;;  %vm309_vm3 = vweird.f32 %v303_v42 }
 0x29f   :  { %v316_v50 = vor.u32 1.1754944e-38, %v315_v46  ;;  %vm314_vm5 = vcmp.eq.f32.partialorder %v313_v48, 8.507059e+37 }
 0x2a3   :  { %v446_v43 = vpop.eup %445 }
 0x2a4   :  { %v305_v44 = vmul.f32 %v446_v43, %v303_v42  ;;  %vm310_vm2 = vweird.f32 %v446_v43 }
 0x2a5   :  { %vm311_vm4 = vmor %vm309_vm3, %vm310_vm2 }
 0x2a6   :  { %v306_v45 = vsub.f32 1.0, %v305_v44 }
 0x2a8   :  { %v307_v47 = vmul.f32 %v446_v43, %v306_v45 }
 0x2aa   :  { %v308_v49 = vadd.f32 %v446_v43, %v307_v47 }
 0x2ac   :  { %v312_v51 = vsel %vm311_vm4, %v446_v43, %v308_v49 }
 0x2ad   :  { %v317_v52 = vsel %vm314_vm5, %v316_v50, %v312_v51 }
 0x2ae   :  { %v318_v53 = vmul.f32 %v444_v41, %v317_v52 }
 0x2b0   :  { %v320_v54 = vsel %vm319_vm6, %v290_v35, %v318_v53 }
 0x2b1   :  { %v321_v55 = vpack.c.bf16 %v320_v54, %v320_v54 }
 0x2b3   :  { %322 = vst [vmem:[#allocation10] sm:$0xf] %v321_v55 }
 0x2b4   :  { %333 = dma.vmem_to_hbm [thread:$0]  %s329_s6, 64, %s331_s26, [#allocation4]  }
 0x2b5   :  { %573 = dma.done.wait [#allocation4], 64  }
 0x2b6   :  { %574 = vsyncadd [#allocation4], 4294967232 }
 0x2b7   :  { %338 = vsyncpa [#allocation3], 1 }
 0x2b8   :  { %339 = vsyncpa [#allocation6], 1 }
 0x2b9   :  { %340 = vsyncpa [#allocation9], 1 }
 0x2ba   :  { %341 = vsyncpa [#allocation4], 1 }

</bundles_post_ra>
